<compile_context>
chip_gen: v7x
topology: tpu7x:2x2x1
jax: 0.10.0
libtpu: 0.0.40
codegen_flags: <defaults>
</compile_context>

<pallas_src>
import functools
import math

import jax
import jax.numpy as jnp
from jax import lax
from jax.experimental import pallas as pl
from jax.experimental.pallas import tpu as pltpu


def _embed_kernel(seq_ref, w_ref, b_ref, pos_ref, out_ref, *, approximate_gelu):
    """Fused Linear(1->D_text) + GELU, plus one-shot copy of the pre-tiled pos table.

    seq_ref : (TR, 1)            flattened (batch*length) rows of the sequence
    w_ref   : (1, D_text)        fc1 weight (torch weight (D_text, 1) laid out as a row)
    b_ref   : (1, D_text)        fc1 bias
    pos_ref : (TR, D_pos)        batch-invariant sin/cos table, pre-tiled to the row block
    out_ref : (TR, D_text+D_pos)
    """
    d_text = w_ref.shape[1]

    # fc1: Linear(in_features=1, out_features=D_text) == broadcast outer product + bias.
    # Stays on the VPU on purpose (a K=1 matmul would waste the MXU); the (TR, 1) column
    # layout is kept deliberately (lane-major would need an XLU transpose per tile).
    x = seq_ref[...] * w_ref[...] + b_ref[...]                      # (TR, D_text)

    if approximate_gelu:
        # tanh-based GELU: the transcendental runs in the EUP slot (otherwise idle),
        # removing the long VPU erf polynomial that makes the exact path VALU-bound.
        c = math.sqrt(2.0 / math.pi)
        x = 0.5 * x * (1.0 + jnp.tanh(c * (x + 0.044715 * (x * x * x))))
    else:
        # torch.nn.GELU() default: exact (erf) formulation.
        x = 0.5 * x * (1.0 + lax.erf(x * (1.0 / math.sqrt(2.0))))

    # Lane-aligned main store (d_text is a multiple of 128 in the default config; a
    # non-multiple would only degrade this to masked partial stores, never correctness).
    out_ref[:, :d_text] = x

    # Positional-encoding tail: ONE contiguous store of the pre-tiled table
    # (replaces the previous loop of `reps` small masked (L, d_pos) sub-stores).
    out_ref[:, d_text:] = pos_ref[...]


def _choose_rows_per_block(B, L, target_rows=1024):
    """Pick a row-tile size: a multiple of L (so the pos table tiles evenly) dividing B*L.

    target_rows=1024 keeps the ~0.35 us per-grid-step overhead at the few-percent level
    and gives the DMA engine large contiguous writes, while the double-buffered output
    tile stays ~9 MiB at production dims (D=1088) — inside v5e's 16 MiB scoped-VMEM
    default, so no vmem_limit override is needed.  When B >= 2 the block is capped to at
    most half the batch so the grid has >= 2 steps and v7x's 2 TensorCores both get work.
    """
    bpt = min(B, max(1, target_rows // max(L, 1)))
    if B >= 2:
        bpt = min(bpt, max(1, B // 2))       # guarantee >= 2 grid steps for v7x megacore
    while B % bpt != 0:
        bpt -= 1
    tr = bpt * L
    # (8, 128) rule: second-to-last block dim must be a multiple of 8 or the full extent.
    if tr % 8 != 0 and tr != B * L:
        tr = B * L
    return tr


def analog_diffusion_embedding(sequences, fc1_w, fc1_b, inv_freq,
                               embed_dim_position=None, approximate_gelu=False):
    """Context embedding x: (B, L, text_embed_dim + embed_dim_position), float32."""
    B, L = sequences.shape
    d_text = fc1_w.shape[1]
    ch = inv_freq.shape[1] * 2                       # PositionalEncoding1D padded channels
    d_pos = ch if embed_dim_position is None else embed_dim_position
    D = d_text + d_pos
    R = B * L

    # Batch-invariant PositionalEncoding1D table, computed ONCE in plain JAX (hoisted out
    # of the kernel): emb = cat(sin(pos*inv_freq), cos(pos*inv_freq), -1)[:, :d_pos].
    # NOTE: the spec's PyTorch module uses torch.cat([sin, cos]) (NOT interleaved stack),
    # so this channel ordering matches it exactly; the [:, :d_pos] slice reproduces the
    # odd-channel zero-pad-then-truncate behaviour of the reference module.
    pos = jnp.arange(L, dtype=jnp.float32)[:, None]                  # (L, 1)
    sin_inp = pos * inv_freq[0][None, :]                             # (L, ch/2)
    pos_table = jnp.concatenate([jnp.sin(sin_inp), jnp.cos(sin_inp)], axis=-1)[:, :d_pos]

    # One contiguous (B*L, 1) slab == sequences.float().unsqueeze(2), rows flattened.
    seq_flat = sequences.astype(jnp.float32).reshape(R, 1)

    tr = _choose_rows_per_block(B, L)
    reps = tr // L
    grid = (R // tr,)

    # Pre-tile the pos table to the full row block so the kernel writes it with a single
    # contiguous vst (the block index is constant across the grid, so it stays resident).
    pos_tiled = jnp.tile(pos_table, (reps, 1))                       # (tr, d_pos)

    # Per-step VMEM (double-buffered): ~2*tr*(D + 128 + d_pos)*4 B ≈ 10.5 MiB at
    # production dims (tr=1024, D=1088) — fits every generation's scoped default.
    kernel = functools.partial(_embed_kernel, approximate_gelu=approximate_gelu)

    out = pl.pallas_call(
        kernel,
        out_shape=jax.ShapeDtypeStruct((R, D), jnp.float32),
        grid_spec=pltpu.PrefetchScalarGridSpec(
            num_scalar_prefetch=0,
            grid=grid,
            in_specs=[
                pl.BlockSpec((tr, 1), lambda r: (r, 0)),        # sequence rows (column)
                pl.BlockSpec((1, d_text), lambda r: (0, 0)),    # fc1 weight row
                pl.BlockSpec((1, d_text), lambda r: (0, 0)),    # fc1 bias row
                pl.BlockSpec((tr, d_pos), lambda r: (0, 0)),    # pre-tiled pos table
            ],
            out_specs=pl.BlockSpec((tr, D), lambda r: (r, 0)),
        ),
        # "parallel" lets the (>=2-step) grid shard across v7x's 2 TensorCores;
        # near-zero cost on v5e/v6e.
        compiler_params=pltpu.CompilerParams(dimension_semantics=("parallel",)),
    )(seq_flat, fc1_w, fc1_b, pos_tiled)

    return out.reshape(B, L, D)


def analog_diffusion_full_forward(sequences, output, fc1_w, fc1_b, inv_freq,
                                  max_length, embed_dim_position=None,
                                  predict_neighbors=True, approximate_gelu=False):
    """Forward pass of AnalogDiffusionFull up to the (unavailable) diffusion loss."""
    # output slicing / concat (pure indexing glue, exactly as in the PyTorch code)
    output_xyz = output[:, 1:4, :]
    output_neighbors = output[:, 4:4 + max_length, :]
    if predict_neighbors:
        output_cat = jnp.concatenate([output_xyz, output_neighbors], axis=1)
    else:
        output_cat = output

    # embedding hot-path in Pallas (float32 for parity with torch; a bf16 cast-on-store
    # is only worthwhile once the kernel is store-bound, i.e. with approximate_gelu).
    x = analog_diffusion_embedding(sequences, fc1_w, fc1_b, inv_freq,
                                   embed_dim_position=embed_dim_position,
                                   approximate_gelu=approximate_gelu)

    # TODO(synk): loss = XDiffusion_x('k')(output_cat, embedding=x) — external net,
    #             not reproducible here.
    return x, output_cat


def _reference_embedding(sequences, fc1_w, fc1_b, inv_freq, embed_dim_position,
                         approximate_gelu=False):
    """Pure-JAX reference of the PyTorch semantics, for a correctness check."""
    B, L = sequences.shape
    x = sequences.astype(jnp.float32)[..., None] * fc1_w + fc1_b          # (B, L, D_text)
    x = jax.nn.gelu(x, approximate=approximate_gelu)
    pos = jnp.arange(L, dtype=jnp.float32)
    sin_inp = pos[:, None] * inv_freq[0][None, :]                         # (L, ch/2)
    emb = jnp.concatenate([jnp.sin(sin_inp), jnp.cos(sin_inp)], axis=-1)
    emb = emb[:, :embed_dim_position]                                     # (L, D_pos)
    emb = jnp.broadcast_to(emb[None], (B,) + emb.shape)
    return jnp.concatenate([x, emb], axis=-1)


if __name__ == "__main__":
    # small, module-consistent shapes
    B = 2                       # batch
    L = 32                      # sequence length (context_embedding_max_length)
    text_embed_dim = 256        # (scaled-down from default 1024; multiple of 128)
    embed_dim_position = 64     # default (even -> no zero-pad channel to drop)
    max_length = 16             # (scaled-down from default 1024)

    key = jax.random.PRNGKey(0)
    k_seq, k_out, k_w, k_b = jax.random.split(key, 4)

    sequences = jax.random.normal(k_seq, (B, L), dtype=jnp.float32)
    output = jax.random.normal(k_out, (B, 4 + max_length, max_length), dtype=jnp.float32)

    # fc1 = nn.Linear(1, text_embed_dim): weight (text_embed_dim, 1), bias (text_embed_dim,)
    # deterministic synthetic init, laid out as (1, D_text) rows for lane-dense access.
    fc1_w = (jax.random.normal(k_w, (text_embed_dim,), dtype=jnp.float32) * 0.5)[None, :]
    fc1_b = (jax.random.normal(k_b, (text_embed_dim,), dtype=jnp.float32) * 0.1)[None, :]

    # PositionalEncoding1D buffer: inv_freq = 1 / 10000^(arange(0, ch, 2)/ch),
    # ch = ceil(embed_dim_position/2)*2
    ch = int(math.ceil(embed_dim_position / 2) * 2)
    inv_freq = (1.0 / (10000.0 ** (jnp.arange(0, ch, 2, dtype=jnp.float32) / ch)))[None, :]

    # --- exact-erf GELU (torch.nn.GELU() default semantics) ---------------------------
    x_emb, output_cat = analog_diffusion_full_forward(
        sequences, output, fc1_w, fc1_b, inv_freq,
        max_length=max_length, embed_dim_position=embed_dim_position,
        predict_neighbors=True, approximate_gelu=False)
    x_emb = jax.block_until_ready(x_emb)
    output_cat = jax.block_until_ready(output_cat)

    assert x_emb.shape == (B, L, text_embed_dim + embed_dim_position)
    assert output_cat.shape == (B, 3 + max_length, max_length)

    ref = _reference_embedding(sequences, fc1_w, fc1_b, inv_freq, embed_dim_position,
                               approximate_gelu=False)
    assert jnp.allclose(x_emb, ref, atol=3e-5, rtol=3e-5), "exact-GELU mismatch vs reference"

    # --- optional fast path: tanh GELU (EUP slot), gated behind the flag ---------------
    x_fast = analog_diffusion_embedding(sequences, fc1_w, fc1_b, inv_freq,
                                        embed_dim_position=embed_dim_position,
                                        approximate_gelu=True)
    x_fast = jax.block_until_ready(x_fast)
    ref_fast = _reference_embedding(sequences, fc1_w, fc1_b, inv_freq, embed_dim_position,
                                    approximate_gelu=True)
    assert jnp.allclose(x_fast, ref_fast, atol=1e-4, rtol=1e-4), \
        "approx-GELU mismatch vs reference"

    print("KERNEL_OK")
</pallas_src>

<mosaic_0001>
module attributes {stable_mosaic.version = 11 : i64} {
  func.func @_embed_kernel(%arg0: i32, %arg1: memref<32x1xf32, #tpu.memory_space<vmem>>, %arg2: memref<1x256xf32, #tpu.memory_space<vmem>>, %arg3: memref<1x256xf32, #tpu.memory_space<vmem>>, %arg4: memref<32x64xf32, #tpu.memory_space<vmem>>, %arg5: memref<32x320xf32, #tpu.memory_space<vmem>>) attributes {dimension_semantics = [#tpu.dimension_semantics<parallel>], iteration_bounds = array<i64: 2>, scalar_prefetch = 0 : i64, scratch_operands = 0 : i64, tpu.core_type = #tpu.core_type<tc>, window_params = [{transform_indices = @transform_0, window_bounds = array<i64: 32, 1>}, {pipeline_mode = #tpu.pipeline_mode<synchronous>, transform_indices = @transform_1, window_bounds = array<i64: 1, 256>}, {pipeline_mode = #tpu.pipeline_mode<synchronous>, transform_indices = @transform_2, window_bounds = array<i64: 1, 256>}, {pipeline_mode = #tpu.pipeline_mode<synchronous>, transform_indices = @transform_3, window_bounds = array<i64: 32, 64>}, {transform_indices = @transform_4, window_bounds = array<i64: 32, 320>}]} {
    %c0 = arith.constant 0 : index
    %c0_0 = arith.constant 0 : index
    %0 = vector.load %arg1[%c0, %c0_0] : memref<32x1xf32, #tpu.memory_space<vmem>>, vector<32x1xf32>
    %c0_1 = arith.constant 0 : index
    %c0_2 = arith.constant 0 : index
    %1 = vector.load %arg2[%c0_1, %c0_2] : memref<1x256xf32, #tpu.memory_space<vmem>>, vector<1x256xf32>
    %2 = vector.broadcast %0 : vector<32x1xf32> to vector<32x256xf32>
    %3 = vector.broadcast %1 : vector<1x256xf32> to vector<32x256xf32>
    %4 = arith.mulf %2, %3 : vector<32x256xf32>
    %c0_3 = arith.constant 0 : index
    %c0_4 = arith.constant 0 : index
    %5 = vector.load %arg3[%c0_3, %c0_4] : memref<1x256xf32, #tpu.memory_space<vmem>>, vector<1x256xf32>
    %6 = vector.broadcast %5 : vector<1x256xf32> to vector<32x256xf32>
    %7 = arith.addf %4, %6 : vector<32x256xf32>
    %cst = arith.constant 5.000000e-01 : f32
    %8 = vector.broadcast %cst : f32 to vector<32x256xf32>
    %9 = arith.mulf %8, %7 : vector<32x256xf32>
    %cst_5 = arith.constant 0.707106769 : f32
    %10 = vector.broadcast %cst_5 : f32 to vector<32x256xf32>
    %11 = arith.mulf %7, %10 : vector<32x256xf32>
    %12 = math.erf %11 : vector<32x256xf32>
    %cst_6 = arith.constant 1.000000e+00 : f32
    %13 = vector.broadcast %cst_6 : f32 to vector<32x256xf32>
    %14 = arith.addf %13, %12 : vector<32x256xf32>
    %15 = arith.mulf %9, %14 : vector<32x256xf32>
    %c0_7 = arith.constant 0 : index
    %c0_8 = arith.constant 0 : index
    %16 = vector.load %arg5[%c0_7, %c0_8] : memref<32x320xf32, #tpu.memory_space<vmem>>, vector<32x256xf32>
    tpu.vector_store %arg5[%c0_7, %c0_8], %15 {strides = array<i32>} : memref<32x320xf32, #tpu.memory_space<vmem>>, vector<32x256xf32>,
    %c0_9 = arith.constant 0 : index
    %c0_10 = arith.constant 0 : index
    %17 = vector.load %arg4[%c0_9, %c0_10] : memref<32x64xf32, #tpu.memory_space<vmem>>, vector<32x64xf32>
    %c0_11 = arith.constant 0 : index
    %c256 = arith.constant 256 : index
    %18 = vector.load %arg5[%c0_11, %c256] : memref<32x320xf32, #tpu.memory_space<vmem>>, vector<32x64xf32>
    tpu.vector_store %arg5[%c0_11, %c256], %17 {strides = array<i32>} : memref<32x320xf32, #tpu.memory_space<vmem>>, vector<32x64xf32>,
    return
  }
  func.func @transform_0(%arg0: i32) -> (i32, i32) {
    %c0_i32 = arith.constant 0 : i32
    %c0_i32_0 = arith.constant 0 : i32
    return %arg0, %c0_i32 : i32, i32
  }
  func.func @transform_1(%arg0: i32) -> (i32, i32) {
    %c0_i32 = arith.constant 0 : i32
    %c0_i32_0 = arith.constant 0 : i32
    %c0_i32_1 = arith.constant 0 : i32
    return %c0_i32, %c0_i32_0 : i32, i32
  }
  func.func @transform_2(%arg0: i32) -> (i32, i32) {
    %c0_i32 = arith.constant 0 : i32
    %c0_i32_0 = arith.constant 0 : i32
    %c0_i32_1 = arith.constant 0 : i32
    return %c0_i32, %c0_i32_0 : i32, i32
  }
  func.func @transform_3(%arg0: i32) -> (i32, i32) {
    %c0_i32 = arith.constant 0 : i32
    %c0_i32_0 = arith.constant 0 : i32
    %c0_i32_1 = arith.constant 0 : i32
    return %c0_i32, %c0_i32_0 : i32, i32
  }
  func.func @transform_4(%arg0: i32) -> (i32, i32) {
    %c0_i32 = arith.constant 0 : i32
    %c0_i32_0 = arith.constant 0 : i32
    return %arg0, %c0_i32 : i32, i32
  }
}

</mosaic_0001>

<bundles_post_ra>
// kernel: tpu_custom_call.1
= control target key start
LH: loop header
LB: loop body
LE: loop exit
PB: predicated region body
PF: predicated region fallthrough
CT: control target
= control target key end

     0   :  { %9 = vsyncpa [#allocation3], 0  ;;  %s702_s0 = inlined_call_operand.vmem [shape: f32[64,1], index: 0, kind: input, shape index: {}]   ;;  %s703_s1 = inlined_call_operand.vmem [shape: f32[1,256], index: 1, kind: input, shape index: {}]   ;;  %s704_s2 = inlined_call_operand.vmem [shape: f32[1,256], index: 2, kind: input, shape index: {}]   ;;  %s705_s3 = inlined_call_operand.vmem [shape: f32[32,64], index: 3, kind: input, shape index: {}]   ;;  %s706_s4 = inlined_call_operand.hbm [shape: f32[64,320], index: 4, kind: output, shape index: {}]  }
   0x1   :  { %11 = vsyncpa [#allocation3 + $0x1], 0  ;;  %s563_s15 = smov 0   ;;  %s565_s16 = smov 0  }
   0x2   :  { %s567_s17 = smov 0   ;;  %s569_s18 = smov 0  }
   0x3 LB: > { %s584_s19 = sadd.s32 4294967295, %s532_s18   ;;  %s397_s20 = sadd.s32 4294967294, %s532_s18   ;;  %s532_s18 = sphi %s569_s18, %s712_s18   ;;  %s528_s17 = sphi %s567_s17, %s711_s17   ;;  %s524_s16 = sphi %s565_s16, %s710_s16   ;;  %s520_s15 = sphi %s563_s15, %s709_s15  }
   0x4   : > { %s588_s21 = sadd.s32 1, %s532_s18   ;;  %s113_s22 = sadd.s32 1, %s528_s17 }
   0x5   : > { %s110_s23 = ssub.s32 %s532_s18, %s588_s21  ;;  %p123_p0 = scmp.ne.s32.totalorder %s528_s17, %s524_s16 }
   0x6   : > { %p111_p1 = scmp.eq.s32.totalorder %s110_s23, 0  ;;  %p124_p2 = scmp.eq.s32.totalorder %s584_s19, 1 }
   0x7   : > { %p129_p3 = scmp.ne.s32.totalorder %s524_s16, %s520_s15  ;;  %p130_p4 = scmp.eq.s32.totalorder %s397_s20, 1 }
   0x8   : > { %s599_s24 = scalar_select %p111_p1, %s528_s17, %s113_s22  }
   0x9   : > { %p601_p5 = por %p124_p2, %p123_p0  ;;  %p605_p6 = por %p130_p4, %p129_p3 }
   0xa   : > { %p400_p7 = scmp.ge.s32.totalorder %s532_s18, 1  ;;  %p166_p8 = scmp.lt.s32.totalorder %s532_s18, 3 }
   0xc   : > { %p167_p9 = pnand %p400_p7, %p166_p8 }
   0xd   : > { %s401_s27 = sshll.u32 (!%p167_p9), %s584_s19, 2  ;;  %v534_v0 = vmov (!%p167_p9), 0   ;;  %s189_s6 = sand.u32 (!%p167_p9), 1, %s524_s16   ;;  %v311_v5 = vld [vmem:[%s705_s3] sm:$0xff] (!%p167_p9)  ;;  %v312_v6 = vld [vmem:[%s705_s3 + $0x8] sm:$0xff] (!%p167_p9)  ;;  %v313_v7 = vld [vmem:[%s705_s3 + $0x10] sm:$0xff] (!%p167_p9)  ;;  %v225_v9 = vlaneseq (!%p167_p9) }
   0xe   : > { %170 = sbr.rel (%p167_p9) target bundleno = 196 (0xc4), region = 36  ;;  %453 = vset.pattern.permute.xlu1 (!%p167_p9), %v534_v0  ;;  %452 = vset.pattern.permute.xlu0 (!%p167_p9), %v534_v0  ;;  %p193_p10 = scmp.lt.s32.totalorder (!%p167_p9), %s401_s27, 7  ;;  %vm315_vm0 = vcmask (!%p167_p9), 523264   ;;  %v314_v8 = vld [vmem:[%s705_s3 + $0x18] sm:$0xff] (!%p167_p9)  ;;  %v203_v13 = vld [vmem:[%s703_s1] sm:$0x3] (!%p167_p9) }
   0xf   : > { %s408_s7 = smul.u32 (!%p167_p9), 96, %s189_s6  ;;  %v226_v10 = vshrl.u32 (!%p167_p9), %v225_v9, 7  ;;  %v243_v14 = vld [vmem:[%s704_s2] sm:$0x3] (!%p167_p9)  ;;  %s661_s9 = scalar_lea.sflag (!%p167_p9), [#allocation3], %s189_s6 }
  0x10   : > { %s409_s30 = smul.u32 (!%p167_p9), 1536, %s584_s19  ;;  %s535_s11 = smov (!%p167_p9), [#allocation2]  }
  0x11   : > { %s630_s22 = scalar_lea.vmem (!%p167_p9), [#allocation2], %s408_s7  ;;  %v227_v11 = vsub.s32 (!%p167_p9), 0, %v226_v10  ;;  %v231_v12 = vsub.s32 (!%p167_p9), 1, %v226_v10  ;;  %s474_s12 = sshll.u32 (!%p167_p9), %s535_s11, 4  ;;  %s475_s12 = int_to_ptr.vmem [resolvable:$false] %s474_s12 }
  0x12   : > { %316 = vst.msk [vmem:[%s630_s22 + $0x10] sm:$0xff] (!%p167_p9), %vm315_vm0, %v311_v5  ;;  %317 = vst.msk [vmem:[%s630_s22 + $0x28] sm:$0xff] (!%p167_p9), %vm315_vm0, %v312_v6  ;;  %s652_s8 = scalar_lea.hbm (!%p167_p9), %s706_s4, %s409_s30  ;;  %s476_s13 = scalar_lea.vmem (!%p167_p9), %s475_s12, 3072 }
  0x13   : > { %318 = vst.msk [vmem:[%s630_s22 + $0x40] sm:$0xff] (!%p167_p9), %vm315_vm0, %v313_v7  ;;  %319 = vst.msk [vmem:[%s630_s22 + $0x58] sm:$0xff] (!%p167_p9), %vm315_vm0, %v314_v8  ;;  %v228_v15 = vrot.slane (!%p167_p9), %v203_v13, %v227_v11  ;;  %v232_v16 = vrot.slane (!%p167_p9), %v203_v13, %v231_v12  ;;  %v248_v17 = vrot.slane (!%p167_p9), %v243_v14, %v227_v11 }
  0x14   : > { %v252_v18 = vrot.slane (!%p167_p9), %v243_v14, %v231_v12 }
  0x15   : > { %s714_s27 = smov (!%p193_p10, %s401_s27), 7 }
  0x16   : > { %s402_s28 = sshll.u32 %s714_s27, 3 }
  0x17   : > { %s196_s5 = scalar_lea.vmem %s702_s0, %s402_s28 }
  0x18   : > { %v201_v1 = vld [vmem:[%s196_s5 + $0x10] sm:$0xff]  ;;  %v199_v2 = vld [vmem:[%s196_s5] sm:$0xff]  ;;  %v202_v3 = vld [vmem:[%s196_s5 + $0x18] sm:$0xff] }
  0x19   : > { %216 = vperm.xlu1 %453, %v201_v1   ;;  %206 = vperm.xlu0 %452, %v199_v2   ;;  %v200_v4 = vld [vmem:[%s196_s5 + $0x8] sm:$0xff]  ;;  %s335_s5 = sshll.u32 %s630_s22, 4  ;;  %s654_s5 = int_to_ptr.vmem [resolvable:$true] %s335_s5 }
  0x1a   : > { %s470_s10 = scalar_lea.vmem %s654_s5, 1536  ;;  %p477_p0 = scmp.lt.s32.totalorder %s654_s5, %s475_s12 }
  0x1b   : > { %p471_p11 = scmp.ne.s32.totalorder %s654_s5, %s470_s10  ;;  %p478_p1 = scmp.lt.s32.totalorder %s476_s13, %s470_s10 }
  0x1d   : > { %221 = vperm.xlu1 %453, %v202_v3   ;;  %211 = vperm.xlu0 %452, %v200_v4   ;;  %p472_p12 = pnand %p471_p11, %p601_p5  ;;  %p479_p2 = por %p478_p1, %p477_p0 }
  0x1f   : > { %p473_p13 = pneg %p472_p12 }
  0x21   : > { %p480_p3 = pnand %p479_p2, %p473_p13 }
  0x98   : > { %v217_v19 = vpop.permute.xlu1 %216  ;;  %v207_v20 = vpop.permute.xlu0 %206 }
  0x99   : > { %v239_v21 = vmul.f32 %v228_v15, %v217_v19  ;;  %v240_v22 = vmul.f32 %v232_v16, %v217_v19  ;;  %v235_v23 = vmul.f32 %v228_v15, %v207_v20  ;;  %v236_v24 = vmul.f32 %v232_v16, %v207_v20 }
  0x9b   : > { %v259_v25 = vadd.f32 %v248_v17, %v239_v21  ;;  %v260_v26 = vadd.f32 %v252_v18, %v240_v22  ;;  %v255_v27 = vadd.f32 %v248_v17, %v235_v23  ;;  %v256_v28 = vadd.f32 %v252_v18, %v236_v24 }
  0x9c   : > { %v222_v29 = vpop.permute.xlu1 %221  ;;  %v212_v30 = vpop.permute.xlu0 %211 }
  0x9d   : > { %v275_v31 = vmul.f32 0.70710677, %v259_v25  ;;  %v276_v32 = vmul.f32 0.70710677, %v260_v26  ;;  %v271_v33 = vmul.f32 0.70710677, %v255_v27  ;;  %v241_v35 = vmul.f32 %v228_v15, %v222_v29 }
  0x9e   : > { %v272_v34 = vmul.f32 0.70710677, %v256_v28  ;;  %v242_v36 = vmul.f32 %v232_v16, %v222_v29  ;;  %v237_v37 = vmul.f32 %v228_v15, %v212_v30  ;;  %v238_v38 = vmul.f32 %v232_v16, %v212_v30 }
  0x9f   : > { %454 = verf.f32 %v275_v31  ;;  %v261_v39 = vadd.f32 %v248_v17, %v241_v35  ;;  %v267_v49 = vmul.f32 0.5, %v259_v25  ;;  %v268_v52 = vmul.f32 0.5, %v260_v26 }
  0xa0   : > { %456 = verf.f32 %v276_v32  ;;  %v262_v40 = vadd.f32 %v252_v18, %v242_v36  ;;  %v257_v41 = vadd.f32 %v248_v17, %v237_v37  ;;  %v258_v42 = vadd.f32 %v252_v18, %v238_v38 }
  0xa1   : > { %458 = verf.f32 %v271_v33  ;;  %v277_v43 = vmul.f32 0.70710677, %v261_v39  ;;  %v263_v56 = vmul.f32 0.5, %v255_v27  ;;  %v264_v59 = vmul.f32 0.5, %v256_v28 }
  0xa2   : > { %460 = verf.f32 %v272_v34  ;;  %v278_v44 = vmul.f32 0.70710677, %v262_v40  ;;  %v273_v45 = vmul.f32 0.70710677, %v257_v41  ;;  %v274_v46 = vmul.f32 0.70710677, %v258_v42 }
  0xa3   : > { %462 = verf.f32 %v277_v43  ;;  %v269_v1 = vmul.f32 0.5, %v261_v39  ;;  %v270_v4 = vmul.f32 0.5, %v262_v40  ;;  %v265_v8 = vmul.f32 0.5, %v257_v41 }
  0xa4   : > { %464 = verf.f32 %v278_v44  ;;  %v266_v11 = vmul.f32 0.5, %v258_v42 }
  0xa5   : > { %466 = verf.f32 %v273_v45 }
  0xa6   : > { %468 = verf.f32 %v274_v46 }
  0xa9   : > { %v455_v47 = vpop.eup %454 }
  0xaa   : > { %v457_v48 = vpop.eup %456  ;;  %v291_v50 = vadd.f32 1.0, %v455_v47 }
  0xab   : > { %v459_v51 = vpop.eup %458  ;;  %v292_v53 = vadd.f32 1.0, %v457_v48 }
  0xac   : > { %v461_v54 = vpop.eup %460  ;;  %v299_v55 = vmul.f32 %v291_v50, %v267_v49  ;;  %v287_v57 = vadd.f32 1.0, %v459_v51 }
  0xad   : > { %v300_v58 = vmul.f32 %v292_v53, %v268_v52  ;;  %v288_v60 = vadd.f32 1.0, %v461_v54  ;;  %v463_v62 = vpop.eup %462 }
  0xae   : > { %307 = vst [vmem:[%s630_s22 + $0x30] sm:$0xff] %v299_v55  ;;  %v295_v61 = vmul.f32 %v287_v57, %v263_v56  ;;  %v465_v0 = vpop.eup %464  ;;  %v293_v2 = vadd.f32 1.0, %v463_v62 }
  0xaf   : > { %308 = vst [vmem:[%s630_s22 + $0x38] sm:$0xff] %v300_v58  ;;  %v296_v63 = vmul.f32 %v288_v60, %v264_v59  ;;  %v467_v3 = vpop.eup %466  ;;  %v294_v5 = vadd.f32 1.0, %v465_v0 }
  0xb0   : > { %303 = vst [vmem:[%s630_s22] sm:$0xff] %v295_v61  ;;  %v469_v6 = vpop.eup %468  ;;  %v301_v7 = vmul.f32 %v293_v2, %v269_v1  ;;  %v289_v9 = vadd.f32 1.0, %v467_v3 }
  0xb1   : > { %304 = vst [vmem:[%s630_s22 + $0x8] sm:$0xff] %v296_v63  ;;  %v302_v10 = vmul.f32 %v294_v5, %v270_v4  ;;  %v290_v12 = vadd.f32 1.0, %v469_v6 }
  0xb2   : > { %309 = vst [vmem:[%s630_s22 + $0x48] sm:$0xff] %v301_v7  ;;  %v297_v13 = vmul.f32 %v289_v9, %v265_v8 }
  0xb3   : > { %310 = vst [vmem:[%s630_s22 + $0x50] sm:$0xff] %v302_v10  ;;  %v298_v14 = vmul.f32 %v290_v12, %v266_v11 }
  0xb4   : > { %305 = vst [vmem:[%s630_s22 + $0x18] sm:$0xff] %v297_v13 }
  0xb5   : > { %306 = vst [vmem:[%s630_s22 + $0x20] sm:$0xff] %v298_v14 }
  0xb6   : > { %483 = shalt.err (!%p480_p3)
}
  0xb7   : > { %s484_s6 = scalar_lea.hbm %s652_s8, 1536  ;;  %s488_s22 = scalar_lea.hbm %s706_s4, 3072 }
  0xb8   : > { %p485_p4 = scmp.ne.s32.totalorder %s652_s8, %s484_s6  ;;  %p489_p9 = scmp.lt.u32.totalorder %s652_s8, %s706_s4 }
  0xb9   : > { %p490_p10 = scmp.lt.u32.totalorder %s488_s22, %s484_s6  ;;  %p492_p12 = scmp.lt.u32.totalorder %s484_s6, %s652_s8 }
  0xba   : > { %p486_p7 = pnand %p485_p4, %p601_p5 }
  0xbb   : > { %p491_p11 = por %p490_p10, %p489_p9 }
  0xbc   : > { %p487_p8 = pneg %p486_p7 }
  0xbd   : > { %p493_p13 = por %p492_p12, %p491_p11 }
  0xbf   : > { %p494_p0 = pnand %p493_p13, %p487_p8 }
  0xc1   : > { %497 = shalt.err (!%p494_p0)
}
  0xc2   : > { %s536_s28 = smov 384   ;;  %s537_s29 = smov 24  }
  0xc3   : > { %410 = dma.vmem_to_hbm [thread:$0]  (%p601_p5), %s654_s5, 1536, %s652_s8, %s661_s9, %s536_s28, %s536_s28, %s537_s29  }
  0xc4 PF: > { %p416_p1 = scmp.ge.s32.totalorder %s532_s18, 2  ;;  %s350_s30 = sand.u32 1, %s520_s15  }
  0xc5   : > { %s351_s19 = scalar_lea.sflag [#allocation3], %s350_s30 }
  0xc6   : > { %p413_p2 = pnand %p416_p1, %p605_p6 }
  0xc8   : > { %515 = dma.done.wait (!%p413_p2), %s351_s19, 1536  }
  0xc9   : > { %517 = vsyncadd (!%p413_p2), %s351_s19, 4294965760  ;;  %p14_p3 = scmp.ge.s32.totalorder %s588_s21, 4   ;;  %s709_s15 = smov %s524_s16 }
  0xca   : > { %s710_s16 = smov %s528_s17  ;;  %s711_s17 = smov %s599_s24 }
  0xcb   : > { %s712_s18 = smov %s588_s21  ;;  %16 = sbr.rel (!%p14_p3) target bundleno = 3 (0x3), region = 71 }
  0xd2   :  { %356 = vsyncpa [#allocation3], 1 }
  0xd3   :  { %358 = vsyncpa [#allocation3 + $0x1], 1 }

</bundles_post_ra>
